<compile_context>
chip_gen: v7x
topology: tpu7x:2x2x1
jax: 0.10.0
libtpu: 0.0.40
codegen_flags: <defaults>
</compile_context>

<pallas_src>
import functools

import jax
import jax.numpy as jnp
from jax.experimental import pallas as pl
from jax.experimental.pallas import tpu as pltpu

_LANE = 128


def dueling_critic_kernel(x_ref, w1_ref, b1_ref, weff_ref, beff_ref, o_ref):
    # linear1 (MXU, f32 accumulation) + bias + relu (VPU, f32).
    h = jnp.dot(x_ref[...], w1_ref[...], preferred_element_type=jnp.float32)
    h = jnp.maximum(h + b1_ref[...], 0.0)                          # (TB, H) f32
    # Folded value/advantage heads + dueling mean: one lane-dense MXU matmul.
    out = jnp.dot(h.astype(weff_ref.dtype), weff_ref[...],
                  preferred_element_type=jnp.float32) + beff_ref[...]
    o_ref[...] = out.astype(o_ref.dtype)                           # (TB, O_pad)


def fold_heads(w2, b2, w3, b3):
    """Fold value head, advantage head and dueling mean into one weight/bias,
    zero-padded to a lane-dense (multiple of 128) output width."""
    w_eff = w2 + w3 - jnp.mean(w3, axis=1, keepdims=True)           # (H, O)
    b_eff = b2 + b3 - jnp.mean(b3, axis=1, keepdims=True)           # (1, O)
    o = w_eff.shape[1]
    o_pad = ((o + _LANE - 1) // _LANE) * _LANE
    if o_pad != o:
        # Padded columns are exact zeros; the wrapper slices them off.
        w_eff = jnp.pad(w_eff, ((0, 0), (0, o_pad - o)))
        b_eff = jnp.pad(b_eff, ((0, 0), (0, o_pad - o)))
    return w_eff, b_eff


def prepare_params(w1, b1, w2, b2, w3, b3, *, compute_dtype=jnp.bfloat16):
    """Per-weight-update preprocessing (hoisted out of the forward hot path)."""
    w_eff, b_eff = fold_heads(w2, b2, w3, b3)
    return (w1.astype(compute_dtype),
            b1.astype(jnp.float32),
            w_eff.astype(compute_dtype),
            b_eff.astype(jnp.float32))


def _choose_batch_tile(batch, batch_tile, sublane):
    if batch > batch_tile:
        return batch_tile
    # Whole batch fits in one tile: still try to split into >=2 tiles so the
    # "parallel" batch axis can be sharded across v7x's 2 TensorCores.
    half = -(-batch // 2)                      # ceil(batch / 2)
    half = -(-half // sublane) * sublane       # round up to sublane multiple
    return half if half < batch else batch


@functools.partial(jax.jit, static_argnames=("out_features", "batch_tile"))
def dueling_critic_forward(x, w1_c, b1, weff_c, beff, *, out_features,
                           batch_tile=2048):
    B, D = x.shape
    H = w1_c.shape[1]
    O_pad = weff_c.shape[1]

    x_c = x.astype(w1_c.dtype)
    itemsize = x_c.dtype.itemsize
    sublane = 16 if itemsize == 2 else 8
    tb = _choose_batch_tile(B, batch_tile, sublane)
    grid = (pl.cdiv(B, tb),)

    # VMEM budget derived from actual sizes (double-buffered) plus headroom.
    weight_bytes = (w1_c.size + weff_c.size) * itemsize + (b1.size + beff.size) * 4
    tile_bytes = tb * D * itemsize + tb * O_pad * 4
    vmem_limit = int(min(max(2 * (weight_bytes + tile_bytes) + (4 << 20),
                             32 << 20), 96 << 20))

    cost = pl.CostEstimate(
        flops=2 * B * (D * H + H * O_pad) + 2 * B * H,
        transcendentals=0,
        bytes_accessed=(x_c.size + w1_c.size + weff_c.size) * itemsize
                       + (b1.size + beff.size + B * O_pad) * 4,
    )

    out = pl.pallas_call(
        dueling_critic_kernel,
        out_shape=jax.ShapeDtypeStruct((B, O_pad), jnp.float32),
        grid=grid,
        in_specs=[
            pl.BlockSpec((tb, D), lambda i: (i, 0)),      # x: streamed per tile
            pl.BlockSpec((D, H), lambda i: (0, 0)),       # W1: VMEM-resident
            pl.BlockSpec((1, H), lambda i: (0, 0)),       # b1 (f32)
            pl.BlockSpec((H, O_pad), lambda i: (0, 0)),   # W_eff: VMEM-resident
            pl.BlockSpec((1, O_pad), lambda i: (0, 0)),   # b_eff (f32)
        ],
        out_specs=pl.BlockSpec((tb, O_pad), lambda i: (i, 0)),
        compiler_params=pltpu.CompilerParams(
            dimension_semantics=("parallel",),            # shard batch (v7x 2 TC)
            vmem_limit_bytes=vmem_limit,
        ),
        cost_estimate=cost,
    )(x_c, w1_c, b1, weff_c, beff)

    # Slice off the lane-padding columns (they are exact zeros).
    return out[:, :out_features]


def init_params(key, input_size, output_size, hidden_size):
    """Deterministic PyTorch-style (uniform +/- 1/sqrt(fan_in)) init."""
    ks = jax.random.split(key, 6)

    def uni(k, shape, fan_in):
        bound = 1.0 / jnp.sqrt(fan_in)
        return jax.random.uniform(k, shape, jnp.float32, -bound, bound)

    w1 = uni(ks[0], (input_size, hidden_size), input_size)
    b1 = uni(ks[1], (1, hidden_size), input_size)
    w2 = uni(ks[2], (hidden_size, 1), hidden_size)
    b2 = uni(ks[3], (1, 1), hidden_size)
    w3 = uni(ks[4], (hidden_size, output_size), hidden_size)
    b3 = uni(ks[5], (1, output_size), hidden_size)
    return w1, b1, w2, b2, w3, b3


def reference_forward(x, w1, b1, w2, b2, w3, b3):
    # Mirrors the PyTorch module exactly (linear1 applied twice to the same x).
    x1 = jax.nn.relu(x @ w1 + b1)
    x2 = jax.nn.relu(x @ w1 + b1)
    y1 = x1 @ w2 + b2
    y2 = x2 @ w3 + b3
    return y1 + y2 - jnp.mean(y2, axis=1, keepdims=True)


if __name__ == "__main__":
    input_size, output_size, hidden_size = 16, 8, 32
    batch = 2

    key = jax.random.PRNGKey(0)
    k_x, k_p = jax.random.split(key)
    x = jax.random.normal(k_x, (batch, input_size), jnp.float32)
    params = init_params(k_p, input_size, output_size, hidden_size)

    ref = reference_forward(x, *params)

    # f32 compute path: tight tolerance check against the reference.
    prep_f32 = prepare_params(*params, compute_dtype=jnp.float32)
    out_f32 = dueling_critic_forward(x, *prep_f32, out_features=output_size)
    out_f32 = jax.block_until_ready(out_f32)
    assert out_f32.shape == (batch, output_size)
    assert jnp.allclose(out_f32, ref, atol=1e-5, rtol=1e-5), "f32 mismatch vs reference"

    # Default bf16 MXU path (f32 accumulation): looser tolerance.
    prep_bf16 = prepare_params(*params)            # compute_dtype=bfloat16 default
    out_bf16 = dueling_critic_forward(x, *prep_bf16, out_features=output_size)
    out_bf16 = jax.block_until_ready(out_bf16)
    assert out_bf16.shape == (batch, output_size)
    assert jnp.allclose(out_bf16, ref, atol=1e-1, rtol=1e-1), "bf16 mismatch vs reference"

    print("KERNEL_OK")
</pallas_src>

<mosaic_0001>
module attributes {stable_mosaic.version = 11 : i64} {
  func.func @dueling_critic_kernel(%arg0: i32, %arg1: memref<2x16xf32, #tpu.memory_space<vmem>>, %arg2: memref<16x32xf32, #tpu.memory_space<vmem>>, %arg3: memref<1x32xf32, #tpu.memory_space<vmem>>, %arg4: memref<32x128xf32, #tpu.memory_space<vmem>>, %arg5: memref<1x128xf32, #tpu.memory_space<vmem>>, %arg6: memref<2x128xf32, #tpu.memory_space<vmem>>) attributes {dimension_semantics = [#tpu.dimension_semantics<parallel>], iteration_bounds = array<i64: 1>, scalar_prefetch = 0 : i64, scratch_operands = 0 : i64, tpu.core_type = #tpu.core_type<tc>, window_params = [{transform_indices = @transform_0, window_bounds = array<i64: 2, 16>}, {pipeline_mode = #tpu.pipeline_mode<synchronous>, transform_indices = @transform_1, window_bounds = array<i64: 16, 32>}, {pipeline_mode = #tpu.pipeline_mode<synchronous>, transform_indices = @transform_2, window_bounds = array<i64: 1, 32>}, {pipeline_mode = #tpu.pipeline_mode<synchronous>, transform_indices = @transform_3, window_bounds = array<i64: 32, 128>}, {pipeline_mode = #tpu.pipeline_mode<synchronous>, transform_indices = @transform_4, window_bounds = array<i64: 1, 128>}, {transform_indices = @transform_5, window_bounds = array<i64: 2, 128>}]} {
    %c0 = arith.constant 0 : index
    %c0_0 = arith.constant 0 : index
    %0 = vector.load %arg1[%c0, %c0_0] : memref<2x16xf32, #tpu.memory_space<vmem>>, vector<2x16xf32>
    %c0_1 = arith.constant 0 : index
    %c0_2 = arith.constant 0 : index
    %1 = vector.load %arg2[%c0_1, %c0_2] : memref<16x32xf32, #tpu.memory_space<vmem>>, vector<16x32xf32>
    %cst = arith.constant dense<0.000000e+00> : vector<2x32xf32>
    %2 = tpu.matmul %0, %1, %cst {dimension_numbers = #tpu.dot_dimension_numbers<[1], [0], [0], [1], [0, 0, 1, 1], [], []>} : vector<2x16xf32>, vector<16x32xf32>, vector<2x32xf32> -> vector<2x32xf32>
    %c0_3 = arith.constant 0 : index
    %c0_4 = arith.constant 0 : index
    %3 = vector.load %arg3[%c0_3, %c0_4] : memref<1x32xf32, #tpu.memory_space<vmem>>, vector<1x32xf32>
    %4 = vector.broadcast %3 : vector<1x32xf32> to vector<2x32xf32>
    %5 = arith.addf %2, %4 : vector<2x32xf32>
    %cst_5 = arith.constant 0.000000e+00 : f32
    %6 = vector.broadcast %cst_5 : f32 to vector<2x32xf32>
    %7 = arith.maximumf %5, %6 : vector<2x32xf32>
    %c0_6 = arith.constant 0 : index
    %c0_7 = arith.constant 0 : index
    %8 = vector.load %arg4[%c0_6, %c0_7] : memref<32x128xf32, #tpu.memory_space<vmem>>, vector<32x128xf32>
    %cst_8 = arith.constant dense<0.000000e+00> : vector<2x128xf32>
    %9 = tpu.matmul %7, %8, %cst_8 {dimension_numbers = #tpu.dot_dimension_numbers<[1], [0], [0], [1], [0, 0, 1, 1], [], []>} : vector<2x32xf32>, vector<32x128xf32>, vector<2x128xf32> -> vector<2x128xf32>
    %c0_9 = arith.constant 0 : index
    %c0_10 = arith.constant 0 : index
    %10 = vector.load %arg5[%c0_9, %c0_10] : memref<1x128xf32, #tpu.memory_space<vmem>>, vector<1x128xf32>
    %11 = vector.broadcast %10 : vector<1x128xf32> to vector<2x128xf32>
    %12 = arith.addf %9, %11 : vector<2x128xf32>
    %c0_11 = arith.constant 0 : index
    %c0_12 = arith.constant 0 : index
    %13 = vector.load %arg6[%c0_11, %c0_12] : memref<2x128xf32, #tpu.memory_space<vmem>>, vector<2x128xf32>
    tpu.vector_store %arg6[%c0_11, %c0_12], %12 {strides = array<i32>} : memref<2x128xf32, #tpu.memory_space<vmem>>, vector<2x128xf32>,
    return
  }
  func.func @transform_0(%arg0: i32) -> (i32, i32) {
    %c0_i32 = arith.constant 0 : i32
    %c0_i32_0 = arith.constant 0 : i32
    return %arg0, %c0_i32 : i32, i32
  }
  func.func @transform_1(%arg0: i32) -> (i32, i32) {
    %c0_i32 = arith.constant 0 : i32
    %c0_i32_0 = arith.constant 0 : i32
    %c0_i32_1 = arith.constant 0 : i32
    return %c0_i32, %c0_i32_0 : i32, i32
  }
  func.func @transform_2(%arg0: i32) -> (i32, i32) {
    %c0_i32 = arith.constant 0 : i32
    %c0_i32_0 = arith.constant 0 : i32
    %c0_i32_1 = arith.constant 0 : i32
    return %c0_i32, %c0_i32_0 : i32, i32
  }
  func.func @transform_3(%arg0: i32) -> (i32, i32) {
    %c0_i32 = arith.constant 0 : i32
    %c0_i32_0 = arith.constant 0 : i32
    %c0_i32_1 = arith.constant 0 : i32
    return %c0_i32, %c0_i32_0 : i32, i32
  }
  func.func @transform_4(%arg0: i32) -> (i32, i32) {
    %c0_i32 = arith.constant 0 : i32
    %c0_i32_0 = arith.constant 0 : i32
    %c0_i32_1 = arith.constant 0 : i32
    return %c0_i32, %c0_i32_0 : i32, i32
  }
  func.func @transform_5(%arg0: i32) -> (i32, i32) {
    %c0_i32 = arith.constant 0 : i32
    %c0_i32_0 = arith.constant 0 : i32
    return %arg0, %c0_i32 : i32, i32
  }
}

</mosaic_0001>

<bundles_post_ra>
// kernel: dueling_critic_forward.1
= control target key start
LH: loop header
LB: loop body
LE: loop exit
PB: predicated region body
PF: predicated region fallthrough
CT: control target
= control target key end

     0   :  { %10 = vsyncpa [#allocation3], 0  ;;  %s488_s0 = inlined_call_operand.hbm [shape: f32[2,16], index: 0, kind: input, shape index: {}]   ;;  %s489_s1 = inlined_call_operand.hbm [shape: f32[16,32], index: 1, kind: input, shape index: {}]   ;;  %s490_s2 = inlined_call_operand.vmem [shape: f32[1,32], index: 2, kind: input, shape index: {}]   ;;  %s491_s3 = inlined_call_operand.hbm [shape: f32[32,128], index: 3, kind: input, shape index: {}]   ;;  %s492_s4 = inlined_call_operand.vmem [shape: f32[1,128], index: 4, kind: input, shape index: {}]   ;;  %s493_s5 = inlined_call_operand.hbm [shape: f32[2,128], index: 5, kind: output, shape index: {}]  }
   0x1   :  { %11 = vsyncpa [#allocation6], 0 }
   0x2   :  { %12 = vsyncpa [#allocation4], 0  ;;  %s389_s18 = smov [#allocation5]   ;;  %s295_s22 = scalar_lea.hbm %s489_s1, 256 }
   0x3   :  { %s28_s19 = sshll.u32 %s389_s18, 4  ;;  %p296_p0 = scmp.ne.s32.totalorder %s489_s1, %s295_s22  ;;  %s29_s19 = int_to_ptr.vmem [resolvable:$true] %s28_s19 }
   0x4   :  { %p299_p1 = scmp.lt.u32.totalorder %s295_s22, %s489_s1 }
   0x6   :  { %p301_p2 = pnand %p299_p1, %p296_p0 }
   0x8   :  { %304 = shalt.err (!%p301_p2)
}
   0x9   :  { %s305_s27 = scalar_lea.vmem %s29_s19, 256  ;;  %p310_p4 = scmp.lt.s32.totalorder %s29_s19, %s29_s19 }
   0xa   :  { %p306_p3 = scmp.ne.s32.totalorder %s29_s19, %s305_s27  ;;  %p311_p5 = scmp.lt.s32.totalorder %s305_s27, %s305_s27 }
   0xc   :  { %p312_p6 = por %p311_p5, %p310_p4 }
   0xe   :  { %p313_p7 = pnand %p312_p6, %p306_p3 }
  0x10   :  { %316 = shalt.err (!%p313_p7)
}
  0x11   :  { %s390_s28 = smov 128   ;;  %s391_s29 = smov 8  }
  0x12   :  { %34 = dma.hbm_to_vmem [thread:$0]  %s489_s1, 256, %s29_s19, [#allocation6], %s390_s28, %s390_s28, %s391_s29  }
  0x13   :  { %s392_s7 = smov [#allocation2]   ;;  %s393_s9 = smov [#allocation7]  }
  0x14   :  { %s19_s8 = sshll.u32 %s392_s7, 4  ;;  %s42_s10 = sshll.u32 %s393_s9, 4  ;;  %s20_s8 = int_to_ptr.vmem [resolvable:$true] %s19_s8  ;;  %s43_s10 = int_to_ptr.vmem [resolvable:$true] %s42_s10 }
  0x15   :  { %s317_s13 = scalar_lea.hbm %s488_s0, 32 }
  0x16   :  { %p318_p8 = scmp.ne.s32.totalorder %s488_s0, %s317_s13  ;;  %p321_p9 = scmp.lt.u32.totalorder %s317_s13, %s488_s0 }
  0x18   :  { %p323_p10 = pnand %p321_p9, %p318_p8 }
  0x1a   :  { %326 = shalt.err (!%p323_p10)
}
  0x1b   :  { %s327_s1 = scalar_lea.vmem %s20_s8, 32  ;;  %p332_p12 = scmp.lt.s32.totalorder %s20_s8, %s20_s8 }
  0x1c   :  { %p328_p11 = scmp.ne.s32.totalorder %s20_s8, %s327_s1  ;;  %p333_p13 = scmp.lt.s32.totalorder %s327_s1, %s327_s1 }
  0x1e   :  { %p334_p0 = por %p333_p13, %p332_p12 }
  0x20   :  { %p335_p1 = pnand %p334_p0, %p328_p11 }
  0x22   :  { %338 = shalt.err (!%p335_p1)
}
  0x23   :  { %22 = dma.hbm_to_vmem [thread:$0]  %s488_s0, 32, %s20_s8, [#allocation3]  }
  0x24   :  { %s339_s22 = scalar_lea.hbm %s491_s3, 512 }
  0x25   :  { %p340_p2 = scmp.ne.s32.totalorder %s491_s3, %s339_s22  ;;  %p343_p3 = scmp.lt.u32.totalorder %s339_s22, %s491_s3 }
  0x27   :  { %p345_p4 = pnand %p343_p3, %p340_p2 }
  0x29   :  { %348 = shalt.err (!%p345_p4)
}
  0x2a   :  { %s349_s27 = scalar_lea.vmem %s43_s10, 512  ;;  %p354_p6 = scmp.lt.s32.totalorder %s43_s10, %s43_s10 }
  0x2b   :  { %p350_p5 = scmp.ne.s32.totalorder %s43_s10, %s349_s27  ;;  %p355_p7 = scmp.lt.s32.totalorder %s349_s27, %s349_s27 }
  0x2d   :  { %p356_p8 = por %p355_p7, %p354_p6 }
  0x2f   :  { %p357_p9 = pnand %p356_p8, %p350_p5 }
  0x31   :  { %360 = shalt.err (!%p357_p9)
}
  0x32   :  { %48 = dma.hbm_to_vmem [thread:$0]  %s491_s3, 512, %s43_s10, [#allocation6], %s390_s28, %s390_s28, %s391_s29  }
  0x33   :  { %383 = dma.done.wait [#allocation3], 32  }
  0x34   :  { %384 = vsyncadd [#allocation3], 4294967264 }
  0x35   :  { %385 = dma.done.wait [#allocation6], 768  }
  0x36   :  { %386 = vsyncadd [#allocation6], 4294966528  ;;  %v394_v0 = vmov 0.0|0.0   ;;  %vm395_vm0 = vmmov 0   ;;  %v396_v1 = vmov 0.0   ;;  %v61_v2 = vld [vmem:[#allocation5] sm:$0xff] }
  0x37   :  { %277 = vmatprep.subr.bf16.mxu0 %v394_v0  ;;  %263 = vmatprep.mubr.msk.f32.mxu0 %vm395_vm0, %v396_v1  ;;  %v62_v3 = vld [vmem:[#allocation5 + $0x8] sm:$0xff]  ;;  %v145_v5 = vld [vmem:[#allocation7] sm:$0xff]  ;;  %v146_v6 = vld [vmem:[#allocation7 + $0x8] sm:$0xff]  ;;  %vm70_vm1 = vcmask 130048   ;;  %vm156_vm2 = vcmask 261120   ;;  %s397_s7 = smov [#allocation8]  }
  0x38   :  { %280 = vmatprep.subr.bf16.mxu1 %v394_v0  ;;  %274 = vmatprep.mubr.msk.f32.mxu1 %vm395_vm0, %v396_v1  ;;  %v278_v4 = vpack.c.bf16 %v62_v3, %v61_v2  ;;  %v281_v7 = vpack.c.bf16 %v146_v6, %v145_v5  ;;  %v60_v8 = vld [vmem:[#allocation2] sm:$0x3]  ;;  %v147_v9 = vld [vmem:[#allocation7 + $0x10] sm:$0xff]  ;;  %v148_v10 = vld [vmem:[#allocation7 + $0x18] sm:$0xff]  ;;  %s237_s8 = sshll.u32 %s397_s7, 4  ;;  %s238_s8 = int_to_ptr.vmem [resolvable:$true] %s237_s8 }
  0x39   :  { %v284_v11 = vpack.c.bf16 %v148_v10, %v147_v9  ;;  %v247_v12 = vld [vmem:[%s490_s2] ss:$0 sm:$0xff]  ;;  %s361_s9 = scalar_lea.vmem %s238_s8, 32  ;;  %p366_p11 = scmp.lt.s32.totalorder %s238_s8, %s238_s8 }
  0x3a   :  { %279 = vmatpush3.bf16.msra.mxu0 %v278_v4  ;;  %282 = vmatpush3.bf16.msra.mxu1 %v281_v7  ;;  %v249_v17 = vld [vmem:[%s492_s4] ss:$0 sm:$0xff]  ;;  %p362_p10 = scmp.ne.s32.totalorder %s238_s8, %s361_s9  ;;  %p367_p12 = scmp.lt.s32.totalorder %s361_s9, %s361_s9 }
  0x3b   :  { %283 = vmatprep.subr.bf16.mxu1 %v394_v0 }
  0x3c   :  { %p368_p13 = por %p367_p12, %p366_p11 }
  0x3d   :  { %264 = vmatmul.mubr.msk.f32.vlgmr.msra.gmra.mrb[0].mxu0 %vm70_vm1, %v60_v8 }
  0x3e   :  { %285 = vmatpush3.bf16.msra.mxu1 %v284_v11  ;;  %p369_p0 = pnand %p368_p13, %p362_p10 }
 0x110   :  { %v140_v13 = vpop.f32.mrb[0].mxu0 }
 0x111   :  { %v141_v14 = vadd.f32 %v247_v12, %v140_v13  ;;  %v265_v15 = vpop.f32.mrb[1].mxu0 }
 0x113   :  { %v144_v16 = vmax.f32 %v141_v14, 0.0 }
 0x115   :  { %275 = vmatmul.mubr.msk.f32.vlgmr.msra.gmra.mrb[0].mxu1 %vm156_vm2, %v144_v16 }
 0x1e8   :  { %v226_v18 = vpop.f32.mrb[0].mxu1 }
 0x1e9   :  { %v227_v19 = vadd.f32 %v249_v17, %v226_v18  ;;  %v276_v20 = vpop.f32.mrb[1].mxu1 }
 0x1eb   :  { %230 = vst [vmem:[#allocation8] sm:$0x3] %v227_v19 }
 0x1ec   :  { %372 = shalt.err (!%p369_p0)
}
 0x1ed   :  { %s373_s11 = scalar_lea.hbm %s493_s5, 32 }
 0x1ee   :  { %p374_p1 = scmp.ne.s32.totalorder %s493_s5, %s373_s11  ;;  %p377_p2 = scmp.lt.u32.totalorder %s373_s11, %s493_s5 }
 0x1f0   :  { %p379_p3 = pnand %p377_p2, %p374_p1 }
 0x1f2   :  { %382 = shalt.err (!%p379_p3)
}
 0x1f3   :  { %240 = dma.vmem_to_hbm [thread:$0]  %s238_s8, 32, %s493_s5, [#allocation4]  }
 0x1f4   :  { %387 = dma.done.wait [#allocation4], 32  }
 0x1f5   :  { %388 = vsyncadd [#allocation4], 4294967264 }
 0x1f6   :  { %244 = vsyncpa [#allocation3], 1 }
 0x1f7   :  { %245 = vsyncpa [#allocation6], 1 }
 0x1f8   :  { %246 = vsyncpa [#allocation4], 1 }

</bundles_post_ra>
